<compile_context>
chip_gen: v5e
topology: v5e:2x2
jax: 0.10.0
libtpu: 0.0.40
codegen_flags: <defaults>
</compile_context>

<pallas_src>
import jax
import jax.numpy as jnp
from jax.experimental import pallas as pl
from jax.experimental.pallas import tpu as pltpu

VAL_EXCLUDE = -1.0  # Metrics.val_exclude

_LANES = 128
_SUBLANES = 8
_MAX_BLOCK_ROWS = 4096            # 4096 x 128 x 4B = 2 MiB per f32 tile
_PALLAS_MIN_BYTES = 1 << 20       # below this, plain jnp.where is faster
_VMEM_LIMIT = 32 * 1024 * 1024    # raise v5e's 16 MiB default; safe on v7x (64 MiB phys)


# ---------------------------------------------------------------------------
# Kernels
# ---------------------------------------------------------------------------

def _mask_kernel(y_true_ref, mask_ref):
    # mask = where(y_true == val_exclude, 0, 1)  ==  (y_true != val_exclude)
    mask_ref[...] = (y_true_ref[...] != VAL_EXCLUDE).astype(mask_ref.dtype)


def _masked_array_kernel(y_true_ref, y_arr_ref, out_ref):
    # out = where(y_true == val_exclude, 0, y_arr)
    yt = y_true_ref[...]
    ya = y_arr_ref[...]
    out_ref[...] = jnp.where(yt == VAL_EXCLUDE, jnp.zeros_like(ya), ya)


def _fused_kernel(y_true_ref, y_arr_ref, mask_ref, masked_ref):
    # Single HBM pass over y_true: emit both mask and masked array.
    yt = y_true_ref[...]
    ya = y_arr_ref[...]
    keep = yt != VAL_EXCLUDE
    mask_ref[...] = keep.astype(mask_ref.dtype)
    masked_ref[...] = jnp.where(keep, ya, jnp.zeros_like(ya))


# ---------------------------------------------------------------------------
# Generic elementwise launcher
# ---------------------------------------------------------------------------

def _run_elementwise(kernel, arrays, out_dtypes):
    """Run an elementwise Pallas kernel over flattened/padded lane-dense views."""
    n = arrays[0].size
    flat = [a.reshape(-1) for a in arrays]
    pad = (-n) % (_SUBLANES * _LANES)
    if pad:
        # Pad with 0 (0 != -1, and the pad region is sliced off afterwards).
        flat = [jnp.pad(f, (0, pad)) for f in flat]
    rows = (n + pad) // _LANES
    arrs2d = [f.reshape(rows, _LANES) for f in flat]

    block_rows = min(_MAX_BLOCK_ROWS, rows)  # rows is a multiple of 8 after pad
    grid = (pl.cdiv(rows, block_rows),)
    spec = pl.BlockSpec((block_rows, _LANES), lambda i: (i, 0))

    outs = pl.pallas_call(
        kernel,
        out_shape=[jax.ShapeDtypeStruct((rows, _LANES), dt) for dt in out_dtypes],
        grid=grid,
        in_specs=[spec] * len(arrs2d),
        out_specs=[spec] * len(out_dtypes),
        compiler_params=pltpu.CompilerParams(
            dimension_semantics=("parallel",),
            vmem_limit_bytes=_VMEM_LIMIT),
    )(*arrs2d)

    return [o.reshape(-1)[:n] for o in outs]


def _use_pallas(x, force_pallas):
    return force_pallas or (x.size * x.dtype.itemsize >= _PALLAS_MIN_BYTES)


# ---------------------------------------------------------------------------
# Public ops (Pallas-backed with small-size jnp fallback)
# ---------------------------------------------------------------------------

def get_mask(y_true, force_pallas=False):
    """Pallas version of Metrics.get_mask."""
    if not _use_pallas(y_true, force_pallas):
        return jnp.where(y_true == VAL_EXCLUDE,
                         jnp.zeros_like(y_true), jnp.ones_like(y_true))
    (out,) = _run_elementwise(_mask_kernel, [y_true], [y_true.dtype])
    return out.reshape(y_true.shape)


def get_masked_array(y_true, y_array, force_pallas=False):
    """Pallas version of Metrics.get_masked_array."""
    if not _use_pallas(y_true, force_pallas):
        return jnp.where(y_true == VAL_EXCLUDE, jnp.zeros_like(y_array), y_array)
    (out,) = _run_elementwise(_masked_array_kernel, [y_true, y_array],
                              [y_array.dtype])
    return out.reshape(y_array.shape)


def get_mask_and_masked_array(y_true, y_array, force_pallas=False):
    """Fused: reads y_true from HBM once, returns (mask, masked_array)."""
    if not _use_pallas(y_true, force_pallas):
        keep = y_true != VAL_EXCLUDE
        mask = keep.astype(y_true.dtype)
        masked = jnp.where(keep, y_array, jnp.zeros_like(y_array))
        return mask, masked
    mask, masked = _run_elementwise(_fused_kernel, [y_true, y_array],
                                    [y_true.dtype, y_array.dtype])
    return mask.reshape(y_true.shape), masked.reshape(y_array.shape)


# ---------------------------------------------------------------------------
# Metrics class (JAX/Pallas counterpart of the PyTorch base class)
# ---------------------------------------------------------------------------

class MetricsPallas:
    max_size_memory_safe = 5.0e8
    val_exclude = VAL_EXCLUDE
    count = 0
    _is_cenline_grndtru = False

    def __init__(self, is_masks_exclude=False):
        self.is_masks_exclude = is_masks_exclude
        self.name_fun_out = None

    # TODO(synk): forward() / compute_vec* return NotImplemented in the PyTorch
    # reference (concrete metrics live in subclasses), so there is no further
    # forward hot path to lower beyond the masking kernels above.
    def forward(self, y_true, y_pred):
        return NotImplemented

    def loss(self, y_true, y_pred):
        return self.forward(y_true, y_pred)

    def compute(self, y_true, y_pred):
        if self.is_masks_exclude:
            return self.compute_vec_masked(y_true, y_pred)
        else:
            return self.compute_vec(y_true, y_pred)

    def compute_vec(self, y_true, y_pred):
        return NotImplemented

    def compute_vec_masked(self, y_true, y_pred):
        return NotImplemented

    # Concrete, Pallas-backed tensor ops of the base class:
    def get_mask(self, y_true, force_pallas=False):
        return get_mask(y_true, force_pallas=force_pallas)

    def get_masked_array(self, y_true, y_array, force_pallas=False):
        return get_masked_array(y_true, y_array, force_pallas=force_pallas)

    def get_mask_and_masked_array(self, y_true, y_array, force_pallas=False):
        return get_mask_and_masked_array(y_true, y_array, force_pallas=force_pallas)


# ---------------------------------------------------------------------------
# Demo / self-check
# ---------------------------------------------------------------------------

def _make_inputs(key, shape):
    k1, k2, k3 = jax.random.split(key, 3)
    y_true = jax.random.uniform(k1, shape, dtype=jnp.float32)
    excl = jax.random.bernoulli(k2, p=0.25, shape=shape)
    y_true = jnp.where(excl, jnp.float32(VAL_EXCLUDE), y_true)
    y_pred = jax.random.uniform(k3, shape, dtype=jnp.float32)
    return y_true, y_pred


def _ref(y_true, y_pred):
    ref_mask = jnp.where(y_true == VAL_EXCLUDE,
                         jnp.zeros_like(y_true), jnp.ones_like(y_true))
    ref_masked = jnp.where(y_true == VAL_EXCLUDE,
                           jnp.zeros_like(y_pred), y_pred)
    return ref_mask, ref_masked


if __name__ == "__main__":
    key = jax.random.PRNGKey(0)
    metrics = MetricsPallas(is_masks_exclude=True)

    # --- Primary small NCHW demo: batch=2, channels=4, spatial=16x16 ---------
    shape = (2, 4, 16, 16)
    y_true, y_pred = _make_inputs(key, shape)
    ref_mask, ref_masked = _ref(y_true, y_pred)

    # Pallas path (forced, since the demo tensor is below the size threshold).
    mask_p = metrics.get_mask(y_true, force_pallas=True)
    masked_p = metrics.get_masked_array(y_true, y_pred, force_pallas=True)
    mask_f, masked_f = metrics.get_mask_and_masked_array(
        y_true, y_pred, force_pallas=True)
    jax.block_until_ready((mask_p, masked_p, mask_f, masked_f))

    assert mask_p.shape == y_true.shape and mask_p.dtype == y_true.dtype
    assert masked_p.shape == y_pred.shape and masked_p.dtype == y_pred.dtype
    assert jnp.array_equal(mask_p, ref_mask)
    assert jnp.array_equal(masked_p, ref_masked)
    assert jnp.array_equal(mask_f, ref_mask)
    assert jnp.array_equal(masked_f, ref_masked)

    # Default dispatch (small input -> jnp fallback path) must agree too.
    mask_s = metrics.get_mask(y_true)
    masked_s = metrics.get_masked_array(y_true, y_pred)
    jax.block_until_ready((mask_s, masked_s))
    assert jnp.array_equal(mask_s, ref_mask)
    assert jnp.array_equal(masked_s, ref_masked)

    # --- Irregular shape: exercises the pad-to-(8x128) path ------------------
    key2 = jax.random.PRNGKey(0)
    shape_odd = (3, 5, 7, 11)   # 1155 elements, not a multiple of 128
    yt_o, yp_o = _make_inputs(key2, shape_odd)
    ref_mask_o, ref_masked_o = _ref(yt_o, yp_o)
    mask_o, masked_o = metrics.get_mask_and_masked_array(
        yt_o, yp_o, force_pallas=True)
    jax.block_until_ready((mask_o, masked_o))
    assert mask_o.shape == shape_odd and masked_o.shape == shape_odd
    assert jnp.array_equal(mask_o, ref_mask_o)
    assert jnp.array_equal(masked_o, ref_masked_o)

    print("KERNEL_OK")
</pallas_src>

<mosaic_0001>
module attributes {stable_mosaic.version = 11 : i64} {
  func.func @_mask_kernel(%arg0: i32, %arg1: memref<16x128xf32, #tpu.memory_space<vmem>>, %arg2: memref<16x128xf32, #tpu.memory_space<vmem>>) attributes {dimension_semantics = [#tpu.dimension_semantics<parallel>], iteration_bounds = array<i64: 1>, scalar_prefetch = 0 : i64, scratch_operands = 0 : i64, tpu.core_type = #tpu.core_type<tc>, window_params = [{transform_indices = @transform_0, window_bounds = array<i64: 16, 128>}, {transform_indices = @transform_1, window_bounds = array<i64: 16, 128>}]} {
    %c0 = arith.constant 0 : index
    %c0_0 = arith.constant 0 : index
    %0 = vector.load %arg1[%c0, %c0_0] : memref<16x128xf32, #tpu.memory_space<vmem>>, vector<16x128xf32>
    %cst = arith.constant -1.000000e+00 : f32
    %1 = vector.broadcast %cst : f32 to vector<16x128xf32>
    %2 = arith.cmpf one, %0, %1 : vector<16x128xf32>
    %3 = arith.extui %2 : vector<16x128xi1> to vector<16x128xi32>
    %4 = arith.sitofp %3 : vector<16x128xi32> to vector<16x128xf32>
    %c0_1 = arith.constant 0 : index
    %c0_2 = arith.constant 0 : index
    %5 = vector.load %arg2[%c0_1, %c0_2] : memref<16x128xf32, #tpu.memory_space<vmem>>, vector<16x128xf32>
    tpu.vector_store %arg2[%c0_1, %c0_2], %4 {strides = array<i32>} : memref<16x128xf32, #tpu.memory_space<vmem>>, vector<16x128xf32>,
    return
  }
  func.func @transform_0(%arg0: i32) -> (i32, i32) {
    %c0_i32 = arith.constant 0 : i32
    %c0_i32_0 = arith.constant 0 : i32
    return %arg0, %c0_i32 : i32, i32
  }
  func.func @transform_1(%arg0: i32) -> (i32, i32) {
    %c0_i32 = arith.constant 0 : i32
    %c0_i32_0 = arith.constant 0 : i32
    return %arg0, %c0_i32 : i32, i32
  }
}

</mosaic_0001>

<bundles_post_ra>
// kernel: tpu_custom_call.1
= control target key start
LH: loop header
LB: loop body
LE: loop exit
PB: predicated region body
PF: predicated region fallthrough
CT: control target
= control target key end

     0   :  { %6 = vsyncpa [#allocation3], 0  ;;  %s134_s0 = inlined_call_operand.hbm [shape: f32[16,128], index: 0, kind: input, shape index: {}]   ;;  %s135_s1 = inlined_call_operand.hbm [shape: f32[16,128], index: 1, kind: output, shape index: {}]  }
   0x1   :  { %7 = vsyncpa [#allocation4], 0  ;;  %s12_s8 = sshll.u32 %s134_s0, 4  ;;  %s113_s9 = smov [#allocation2]   ;;  %s13_s8 = int_to_ptr.hbm [resolvable:$true] %s12_s8 }
   0x2   :  { %s14_s10 = sshll.u32 %s113_s9, 4  ;;  %s114_s11 = smov 128   ;;  %s15_s10 = int_to_ptr.vmem [resolvable:$true] %s14_s10 }
   0x3   :  { %s115_s12 = smov 8  }
   0x4   :  { %20 = dma.hbm_to_vmem [thread:$0]  %s13_s8, 256, %s15_s10, [#allocation3], %s114_s11, %s114_s11, %s115_s12  }
   0x5   :  { %109 = dma.done.wait [#allocation3], 256  }
   0x6   :  { %110 = vsyncadd [#allocation3], 4294967040  ;;  %s116_s13 = smov [#allocation5]   ;;  %s41_s17 = sshll.u32 %s135_s1, 4  ;;  %v25_v0 = vld [vmem:[#allocation2] sm:$0xff]  ;;  %v26_v1 = vld [vmem:[#allocation2 + $0x8] sm:$0xff]  ;;  %s42_s17 = int_to_ptr.hbm [resolvable:$true] %s41_s17 }
   0x7   :  { %s39_s14 = sshll.u32 %s116_s13, 4  ;;  %vm27_vm0 = vcmp.ne.f32.partialorder %v25_v0, -1.0  ;;  %vm28_vm1 = vcmp.ne.f32.partialorder %v26_v1, -1.0  ;;  %v117_v2 = vmov 0.0   ;;  %s40_s14 = int_to_ptr.vmem [resolvable:$true] %s39_s14 }
   0x8   :  { %v54_v3 = vsel %vm27_vm0, 1.0, %v117_v2  ;;  %v55_v4 = vsel %vm28_vm1, 1.0, %v117_v2 }
   0x9   :  { %33 = vst [vmem:[#allocation5] sm:$0xff] %v54_v3 }
   0xa   :  { %34 = vst [vmem:[#allocation5 + $0x8] sm:$0xff] %v55_v4 }
   0xb   :  { %47 = dma.vmem_to_hbm [thread:$0]  %s40_s14, 256, %s42_s17, [#allocation4], %s114_s11, %s114_s11, %s115_s12  }
   0xc   :  { %111 = dma.done.wait [#allocation4], 256  }
   0xd   :  { %112 = vsyncadd [#allocation4], 4294967040 }
   0xe   :  { %52 = vsyncpa [#allocation3], 1 }
   0xf   :  { %53 = vsyncpa [#allocation4], 1 }

</bundles_post_ra>
